<compile_context>
chip_gen: v7x
topology: tpu7x:2x2x1
jax: 0.10.0
libtpu: 0.0.40
codegen_flags: <defaults>
</compile_context>

<pallas_src>
import functools

import jax
import jax.numpy as jnp
from jax import lax
from jax.experimental import pallas as pl
from jax.experimental.pallas import tpu as pltpu


_MIB = 1024 * 1024
_LANE = 128
_SUBLANE = 8


def _round_up(x, m):
    return ((x + m - 1) // m) * m


@functools.lru_cache(maxsize=None)
def _vmem_budget():
    """Returns (block_budget_bytes, vmem_limit_bytes) sized from physical VMEM.

    Falls back to the smallest per-core VMEM (v7x: 64 MiB) if the hardware
    query is unavailable, so the result is safe on every generation.
    """
    cap = None
    try:
        info = pltpu.get_tpu_info()
        cap = int(getattr(info, "vmem_capacity_bytes", 0)) or None
    except Exception:
        cap = None
    if not cap or cap <= 0:
        cap = 64 * _MIB
    vmem_limit = min((cap * 3) // 4, 80 * _MIB)
    block_budget = max(vmem_limit - 12 * _MIB, 8 * _MIB)
    return block_budget, vmem_limit


def _pick_td(D):
    """Feature (lane) tile width.

    Full width for narrow features (single fully-contiguous strip, best DMA on
    single-TensorCore chips); >=2 lane-dense tiles for wide features so the
    "parallel" feature axis also feeds both v7x TensorCores.
    """
    if D <= 384:
        return D
    for cand in (512, 384, 256, 128):
        if D % cand == 0 and D // cand >= 2:
            return cand
    # No exact 128-multiple divisor: take a ragged tail (OOB columns are
    # discarded on writeback, no masking needed).
    return 512 if D > 640 else 256


# --------------------------------------------------------------------------
# Kernels
# --------------------------------------------------------------------------
def _fused_kernel(x_ref, o_ref, min_ref, max_ref, *, to_min, to_max, eps):
    """Single-read path: reduce + apply on a VMEM-resident (N, td) strip."""
    x = x_ref[...]                                       # (N, td)
    x_min = jnp.min(x, axis=0, keepdims=True)            # (1, td), exact in dtype
    x_max = jnp.max(x, axis=0, keepdims=True)
    min_ref[...] = x_min
    max_ref[...] = x_max
    mn = x_min.astype(jnp.float32)
    mx = x_max.astype(jnp.float32)
    slope = (to_max - to_min) / (mx - mn + eps)
    offset = to_min - slope * mn
    o_ref[...] = (x.astype(jnp.float32) * slope + offset).astype(o_ref.dtype)


def _reduce_kernel(x_ref, min_ref, max_ref, *,
                   tile_stride, block_rows, n_rows, mask_rows):
    """Pass 1: per-feature min/max accumulated in resident (1,1,td) outputs.

    Grid = (row_split, d_tiles, row_tiles); the last axis is the reduction
    ("arbitrary").  Ragged row tiles are masked to +/-inf so undefined data in
    partially out-of-bounds blocks never reaches the accumulators.  Garbage
    columns (ragged D tiles) only produce garbage in columns that are dropped
    on writeback.
    """
    n = pl.program_id(2)
    x = x_ref[...]                                       # (block_rows, td)
    if mask_rows:
        s = pl.program_id(0)
        row0 = (s * tile_stride + n) * block_rows
        rows = row0 + lax.broadcasted_iota(jnp.int32, (x.shape[0], 1), 0)
        valid = rows < n_rows                            # (block_rows, 1)
        pos_inf = jnp.array(jnp.inf, dtype=x.dtype)
        x_lo = jnp.where(valid, x, pos_inf)
        x_hi = jnp.where(valid, x, -pos_inf)
    else:
        x_lo = x_hi = x
    tile_min = jnp.min(x_lo, axis=0, keepdims=True)[None]   # (1, 1, td)
    tile_max = jnp.max(x_hi, axis=0, keepdims=True)[None]

    @pl.when(n == 0)
    def _():
        min_ref[...] = tile_min
        max_ref[...] = tile_max

    @pl.when(n > 0)
    def _():
        min_ref[...] = jnp.minimum(min_ref[...], tile_min)
        max_ref[...] = jnp.maximum(max_ref[...], tile_max)


def _apply_kernel(x_ref, slope_ref, offset_ref, o_ref):
    """Pass 2: single fused multiply-add per element (f32 math, dtype store)."""
    o_ref[...] = (x_ref[...].astype(jnp.float32) * slope_ref[...]
                  + offset_ref[...]).astype(o_ref.dtype)


# --------------------------------------------------------------------------
# Wrapper
# --------------------------------------------------------------------------
def batch_maxmin_normalization(x, to_min=0.0, to_max=1.0, eps=1e-8,
                               donate_input=False, *,
                               force_two_pass=False, max_block_rows=None):
    """Training-mode forward of Batch_MaxMin_Normalization.

    Returns (normalized_x, min_tensor, max_tensor); min/max have shape
    [1, 1, D] and x's dtype (mirrors the module storing self.min_tensor /
    self.max_tensor).

    donate_input=True aliases x's buffer for the normalized output (only use
    when the caller no longer needs x).  force_two_pass / max_block_rows are
    test hooks to exercise the large-input code path on small shapes.
    """
    assert x.ndim == 3, "expected input of shape [batch, seq, hidden]"
    assert jnp.issubdtype(x.dtype, jnp.floating), "floating-point input expected"
    B, S, D = x.shape
    N = B * S
    dtype = x.dtype
    itemsize = jnp.dtype(dtype).itemsize
    to_min = float(to_min)
    to_max = float(to_max)
    eps = float(eps)

    x2 = x.reshape(N, D)            # collapsing leading dims is layout-free

    block_budget, vmem_limit = _vmem_budget()
    td = _pick_td(D)
    n_d = pl.cdiv(D, td)
    td_lane = _round_up(td, _LANE)          # physical lane footprint per block
    n_sub = _round_up(N, _SUBLANE)          # physical sublane footprint

    alias = {0: 0} if donate_input else {}

    # ---------------- fused single-read path ----------------
    # Whole (N, td) column strip (double-buffered in/out + f32 temps) fits in
    # VMEM: one kernel reduces and applies => 1 read + 1 write of x.
    fused_bytes = n_sub * td_lane * (4 * itemsize + 16)
    if (not force_two_pass) and fused_bytes <= block_budget:
        kern = functools.partial(_fused_kernel,
                                 to_min=to_min, to_max=to_max, eps=eps)
        out2, x_min, x_max = pl.pallas_call(
            kern,
            out_shape=(jax.ShapeDtypeStruct((N, D), dtype),
                       jax.ShapeDtypeStruct((1, D), dtype),
                       jax.ShapeDtypeStruct((1, D), dtype)),
            grid=(n_d,),
            in_specs=[pl.BlockSpec((N, td), lambda d: (0, d))],
            out_specs=(pl.BlockSpec((N, td), lambda d: (0, d)),
                       pl.BlockSpec((1, td), lambda d: (0, d)),
                       pl.BlockSpec((1, td), lambda d: (0, d))),
            compiler_params=pltpu.CompilerParams(
                dimension_semantics=("parallel",),
                vmem_limit_bytes=vmem_limit),
            input_output_aliases=alias,
        )(x2)
        return (out2.reshape(B, S, D),
                x_min.reshape(1, 1, D), x_max.reshape(1, 1, D))

    # ---------------- two-pass path (large inputs) ----------------
    # Pass 1 (reduce).  Footprint ~ 2 double-buffered input blocks + the
    # masked copies => ~5 block-equivalents.
    tn1 = max(_SUBLANE,
              (block_budget // (5 * td_lane * itemsize)) // _SUBLANE * _SUBLANE)
    if max_block_rows is not None:
        tn1 = min(tn1, max(_SUBLANE, _round_up(int(max_block_rows), _SUBLANE)))
    if tn1 >= N:
        tn1 = N
    n_tiles = pl.cdiv(N, tn1)
    # 2-way row split on a leading "parallel" axis so pass 1 uses both v7x
    # TensorCores even when n_d == 1.  The two halves may overlap by one tile
    # when n_tiles is odd (min/max are idempotent, so this is harmless).
    n_split = 2 if n_tiles >= 2 else 1
    tiles_per_split = pl.cdiv(n_tiles, n_split)
    tile_stride = (n_tiles - tiles_per_split) if n_split == 2 else 0
    mask_rows = (N % tn1) != 0

    reduce_kern = functools.partial(
        _reduce_kernel, tile_stride=tile_stride, block_rows=tn1,
        n_rows=N, mask_rows=mask_rows)
    part_min, part_max = pl.pallas_call(
        reduce_kern,
        out_shape=(jax.ShapeDtypeStruct((n_split, 1, D), dtype),
                   jax.ShapeDtypeStruct((n_split, 1, D), dtype)),
        grid=(n_split, n_d, tiles_per_split),
        in_specs=[pl.BlockSpec((tn1, td),
                               lambda s, d, n: (s * tile_stride + n, d))],
        out_specs=(pl.BlockSpec((1, 1, td), lambda s, d, n: (s, 0, d)),
                   pl.BlockSpec((1, 1, td), lambda s, d, n: (s, 0, d))),
        compiler_params=pltpu.CompilerParams(
            dimension_semantics=("parallel", "parallel", "arbitrary"),
            vmem_limit_bytes=vmem_limit),
    )(x2)

    # Tiny host-side epilogue on (n_split, 1, D): fold the <=2 partials and
    # precompute the f32 affine so pass 2 is one multiply-add per element.
    x_min = jnp.min(part_min, axis=0)                     # (1, D), dtype
    x_max = jnp.max(part_max, axis=0)
    mn32 = x_min.astype(jnp.float32)
    mx32 = x_max.astype(jnp.float32)
    slope = (to_max - to_min) / (mx32 - mn32 + eps)       # (1, D) f32
    offset = to_min - slope * mn32                        # (1, D) f32

    # Pass 2 (apply).  Footprint ~ 2 in + 2 out blocks (dtype) + f32 temps.
    tn2 = max(_SUBLANE,
              (block_budget // (td_lane * (4 * itemsize + 16)))
              // _SUBLANE * _SUBLANE)
    if max_block_rows is not None:
        tn2 = min(tn2, max(_SUBLANE, _round_up(int(max_block_rows), _SUBLANE)))
    if tn2 >= N:
        tn2 = N
    n_n2 = pl.cdiv(N, tn2)

    out2 = pl.pallas_call(
        _apply_kernel,
        out_shape=jax.ShapeDtypeStruct((N, D), dtype),
        grid=(n_d, n_n2),
        in_specs=[pl.BlockSpec((tn2, td), lambda d, n: (n, d)),
                  pl.BlockSpec((1, td), lambda d, n: (0, d)),
                  pl.BlockSpec((1, td), lambda d, n: (0, d))],
        out_specs=pl.BlockSpec((tn2, td), lambda d, n: (n, d)),
        compiler_params=pltpu.CompilerParams(
            dimension_semantics=("parallel", "parallel"),
            vmem_limit_bytes=vmem_limit),
        input_output_aliases=alias,
    )(x2, slope, offset)

    # TODO(synk): small-D lane packing ((N, D) -> (N/g, g*D)) would give fully
    # lane-dense stores for D < 128, but a reshape of the minor dim is not
    # layout-free on TPU, so it is skipped here.
    return (out2.reshape(B, S, D),
            x_min.reshape(1, 1, D), x_max.reshape(1, 1, D))


# --------------------------------------------------------------------------
# Reference + tests
# --------------------------------------------------------------------------
def _reference(x, to_min, to_max, eps):
    x_min = jnp.min(jnp.min(x, axis=-2, keepdims=True), axis=-3, keepdims=True)
    x_max = jnp.max(jnp.max(x, axis=-2, keepdims=True), axis=-3, keepdims=True)
    slope = (to_max - to_min) / (x_max - x_min + eps)
    return slope * (x - x_min) + to_min, x_min, x_max


if __name__ == "__main__":
    key = jax.random.PRNGKey(0)
    k1, k2, k3, k4 = jax.random.split(key, 4)
    to_min, to_max, eps = -1.0, 1.0, 1e-8

    # Case 1: canonical small shape (batch=2, seq=8, hidden=32), f32, fused path.
    x1 = jax.random.normal(k1, (2, 8, 32), dtype=jnp.float32)
    out1, mn1, mx1 = batch_maxmin_normalization(x1, to_min, to_max, eps)
    out1 = jax.block_until_ready(out1)
    r1, rmn1, rmx1 = _reference(x1, to_min, to_max, eps)
    assert out1.shape == (2, 8, 32)
    assert mn1.shape == (1, 1, 32) and mx1.shape == (1, 1, 32)
    assert jnp.allclose(out1, r1, atol=1e-5, rtol=1e-5)
    assert jnp.allclose(mn1, rmn1) and jnp.allclose(mx1, rmx1)

    # Case 2: hidden size not a multiple of 128 (full-width lane tile).
    x2 = jax.random.normal(k2, (3, 40, 160), dtype=jnp.float32)
    out2, mn2, mx2 = batch_maxmin_normalization(x2, 0.0, 1.0, eps)
    out2 = jax.block_until_ready(out2)
    r2, rmn2, rmx2 = _reference(x2, 0.0, 1.0, eps)
    assert jnp.allclose(out2, r2, atol=1e-5, rtol=1e-5)
    assert jnp.allclose(mn2, rmn2) and jnp.allclose(mx2, rmx2)

    # Case 3: bf16 input -> min/max exact in bf16, affine in f32, bf16 store.
    x3 = jax.random.normal(k3, (2, 64, 256), dtype=jnp.bfloat16)
    out3, mn3, mx3 = batch_maxmin_normalization(x3, to_min, to_max, eps)
    out3 = jax.block_until_ready(out3)
    r3, _, _ = _reference(x3.astype(jnp.float32), to_min, to_max, eps)
    assert jnp.allclose(out3.astype(jnp.float32), r3, atol=2e-2, rtol=2e-2)

    # Case 4: ragged rows AND ragged feature tiles; run both the fused path
    # and the forced two-pass path (small row blocks) so the in-kernel row
    # masking, the 2-way row split, and OOB column handling are all exercised.
    x4 = jax.random.normal(k4, (3, 37, 520), dtype=jnp.float32)
    r4, rmn4, rmx4 = _reference(x4, to_min, to_max, eps)
    out4a, mn4a, mx4a = batch_maxmin_normalization(x4, to_min, to_max, eps)
    out4a = jax.block_until_ready(out4a)
    assert jnp.allclose(out4a, r4, atol=1e-5, rtol=1e-5)
    assert jnp.allclose(mn4a, rmn4) and jnp.allclose(mx4a, rmx4)
    out4b, mn4b, mx4b = batch_maxmin_normalization(
        x4, to_min, to_max, eps, force_two_pass=True, max_block_rows=32)
    out4b = jax.block_until_ready(out4b)
    assert jnp.allclose(out4b, r4, atol=1e-5, rtol=1e-5)
    assert jnp.allclose(mn4b, rmn4) and jnp.allclose(mx4b, rmx4)

    # TODO(synk): eval-mode path (reusing stored min/max), track_gradients
    # autodiff control and the store_minibatch_min_max Python-list bookkeeping
    # are host-side module state, not kernel work; only the training-mode hot
    # path is implemented.
    print("KERNEL_OK")
</pallas_src>

<mosaic_0001>
module attributes {stable_mosaic.version = 11 : i64} {
  func.func @_fused_kernel(%arg0: i32, %arg1: memref<16x32xf32, #tpu.memory_space<vmem>>, %arg2: memref<16x32xf32, #tpu.memory_space<vmem>>, %arg3: memref<1x32xf32, #tpu.memory_space<vmem>>, %arg4: memref<1x32xf32, #tpu.memory_space<vmem>>) attributes {dimension_semantics = [#tpu.dimension_semantics<parallel>], iteration_bounds = array<i64: 1>, scalar_prefetch = 0 : i64, scratch_operands = 0 : i64, tpu.core_type = #tpu.core_type<tc>, window_params = [{transform_indices = @transform_0, window_bounds = array<i64: 16, 32>}, {transform_indices = @transform_1, window_bounds = array<i64: 16, 32>}, {transform_indices = @transform_2, window_bounds = array<i64: 1, 32>}, {transform_indices = @transform_3, window_bounds = array<i64: 1, 32>}]} {
    %c0 = arith.constant 0 : index
    %c0_0 = arith.constant 0 : index
    %0 = vector.load %arg1[%c0, %c0_0] : memref<16x32xf32, #tpu.memory_space<vmem>>, vector<16x32xf32>
    %cst = arith.constant dense<0x7F800000> : vector<32xf32>
    %1 = vector.multi_reduction <minimumf>, %0, %cst [0] : vector<16x32xf32> to vector<32xf32>
    %2 = vector.shape_cast %1 : vector<32xf32> to vector<1x32xf32>
    %cst_1 = arith.constant dense<0xFF800000> : vector<32xf32>
    %3 = vector.multi_reduction <maximumf>, %0, %cst_1 [0] : vector<16x32xf32> to vector<32xf32>
    %4 = vector.shape_cast %3 : vector<32xf32> to vector<1x32xf32>
    %c0_2 = arith.constant 0 : index
    %c0_3 = arith.constant 0 : index
    %5 = vector.load %arg3[%c0_2, %c0_3] : memref<1x32xf32, #tpu.memory_space<vmem>>, vector<1x32xf32>
    tpu.vector_store %arg3[%c0_2, %c0_3], %2 {strides = array<i32>} : memref<1x32xf32, #tpu.memory_space<vmem>>, vector<1x32xf32>,
    %c0_4 = arith.constant 0 : index
    %c0_5 = arith.constant 0 : index
    %6 = vector.load %arg4[%c0_4, %c0_5] : memref<1x32xf32, #tpu.memory_space<vmem>>, vector<1x32xf32>
    tpu.vector_store %arg4[%c0_4, %c0_5], %4 {strides = array<i32>} : memref<1x32xf32, #tpu.memory_space<vmem>>, vector<1x32xf32>,
    %7 = arith.subf %4, %2 : vector<1x32xf32>
    %cst_6 = arith.constant 9.99999993E-9 : f32
    %8 = vector.broadcast %cst_6 : f32 to vector<1x32xf32>
    %9 = arith.addf %7, %8 : vector<1x32xf32>
    %cst_7 = arith.constant 2.000000e+00 : f32
    %10 = vector.broadcast %cst_7 : f32 to vector<1x32xf32>
    %11 = arith.divf %10, %9 : vector<1x32xf32>
    %12 = arith.mulf %11, %2 : vector<1x32xf32>
    %cst_8 = arith.constant -1.000000e+00 : f32
    %13 = vector.broadcast %cst_8 : f32 to vector<1x32xf32>
    %14 = arith.subf %13, %12 : vector<1x32xf32>
    %15 = vector.broadcast %11 : vector<1x32xf32> to vector<16x32xf32>
    %16 = arith.mulf %0, %15 : vector<16x32xf32>
    %17 = vector.broadcast %14 : vector<1x32xf32> to vector<16x32xf32>
    %18 = arith.addf %16, %17 : vector<16x32xf32>
    %c0_9 = arith.constant 0 : index
    %c0_10 = arith.constant 0 : index
    %19 = vector.load %arg2[%c0_9, %c0_10] : memref<16x32xf32, #tpu.memory_space<vmem>>, vector<16x32xf32>
    tpu.vector_store %arg2[%c0_9, %c0_10], %18 {strides = array<i32>} : memref<16x32xf32, #tpu.memory_space<vmem>>, vector<16x32xf32>,
    return
  }
  func.func @transform_0(%arg0: i32) -> (i32, i32) {
    %c0_i32 = arith.constant 0 : i32
    %c0_i32_0 = arith.constant 0 : i32
    return %c0_i32, %arg0 : i32, i32
  }
  func.func @transform_1(%arg0: i32) -> (i32, i32) {
    %c0_i32 = arith.constant 0 : i32
    %c0_i32_0 = arith.constant 0 : i32
    return %c0_i32, %arg0 : i32, i32
  }
  func.func @transform_2(%arg0: i32) -> (i32, i32) {
    %c0_i32 = arith.constant 0 : i32
    %c0_i32_0 = arith.constant 0 : i32
    return %c0_i32, %arg0 : i32, i32
  }
  func.func @transform_3(%arg0: i32) -> (i32, i32) {
    %c0_i32 = arith.constant 0 : i32
    %c0_i32_0 = arith.constant 0 : i32
    return %c0_i32, %arg0 : i32, i32
  }
}

</mosaic_0001>

<bundles_post_ra>
// kernel: tpu_custom_call.1
= control target key start
LH: loop header
LB: loop body
LE: loop exit
PB: predicated region body
PF: predicated region fallthrough
CT: control target
= control target key end

     0   :  { %9 = vsyncpa [#allocation3], 0  ;;  %s313_s0 = inlined_call_operand.hbm [shape: f32[16,32], index: 0, kind: input, shape index: {}]   ;;  %s314_s1 = inlined_call_operand.hbm [shape: f32[16,32], index: 1, kind: output, shape index: {0}]   ;;  %s315_s2 = inlined_call_operand.hbm [shape: f32[1,32], index: 2, kind: output, shape index: {1}]   ;;  %s316_s3 = inlined_call_operand.hbm [shape: f32[1,32], index: 3, kind: output, shape index: {2}]  }
   0x1   :  { %10 = vsyncpa [#allocation4], 0 }
   0x2   :  { %11 = vsyncpa [#allocation7], 0  ;;  %s209_s12 = smov [#allocation2]   ;;  %s115_s16 = scalar_lea.hbm %s313_s0, 256 }
   0x3   :  { %s17_s13 = sshll.u32 %s209_s12, 4  ;;  %p116_p0 = scmp.ne.s32.totalorder %s313_s0, %s115_s16  ;;  %s18_s13 = int_to_ptr.vmem [resolvable:$true] %s17_s13 }
   0x4   :  { %p119_p1 = scmp.lt.u32.totalorder %s115_s16, %s313_s0 }
   0x6   :  { %p121_p2 = pnand %p119_p1, %p116_p0 }
   0x8   :  { %124 = shalt.err (!%p121_p2)
}
   0x9   :  { %s125_s21 = scalar_lea.vmem %s18_s13, 256  ;;  %p130_p4 = scmp.lt.s32.totalorder %s18_s13, %s18_s13 }
   0xa   :  { %p126_p3 = scmp.ne.s32.totalorder %s18_s13, %s125_s21  ;;  %p131_p5 = scmp.lt.s32.totalorder %s125_s21, %s125_s21 }
   0xc   :  { %p132_p6 = por %p131_p5, %p130_p4 }
   0xe   :  { %p133_p7 = pnand %p132_p6, %p126_p3 }
  0x10   :  { %136 = shalt.err (!%p133_p7)
}
  0x11   :  { %s210_s22 = smov 128   ;;  %s211_s23 = smov 8  }
  0x12   :  { %23 = dma.hbm_to_vmem [thread:$0]  %s313_s0, 256, %s18_s13, [#allocation3], %s210_s22, %s210_s22, %s211_s23  }
  0x13   :  { %203 = dma.done.wait [#allocation3], 256  }
  0x14   :  { %204 = vsyncadd [#allocation3], 4294967040  ;;  %vm29_vm0 = vcmask 261120   ;;  %v250_v0 = vld [vmem:[#allocation2] sm:$0xff]  ;;  %v252_v1 = vld [vmem:[#allocation2 + $0x8] sm:$0xff]  ;;  %s212_s0 = smov [#allocation6]  }
  0x15   :  { %v30_v2 = vsel %vm29_vm0, %v250_v0, inf  ;;  %v31_v3 = vsel %vm29_vm0, %v252_v1, inf  ;;  %v39_v4 = vsel %vm29_vm0, %v250_v0, -inf  ;;  %v40_v5 = vsel %vm29_vm0, %v252_v1, -inf  ;;  %s81_s26 = sshll.u32 %s212_s0, 4  ;;  %s213_s27 = smov [#allocation8]   ;;  %s82_s26 = int_to_ptr.vmem [resolvable:$true] %s81_s26 }
  0x16   :  { %v32_v6 = vmin.f32 %v30_v2, %v31_v3  ;;  %v41_v7 = vmax.f32 %v39_v4, %v40_v5  ;;  %s91_s28 = sshll.u32 %s213_s27, 4  ;;  %vm48_vm1 = vcmask 253952   ;;  %s137_s29 = scalar_lea.vmem %s82_s26, 16  ;;  %s262_s28 = int_to_ptr.vmem [resolvable:$true] %s91_s28 }
  0x17   :  { %p138_p8 = scmp.ne.s32.totalorder %s82_s26, %s137_s29  ;;  %s141_s30 = scalar_lea.vmem %s82_s26, 32 }
  0x18   :  { %v33_v8 = vrot.slane %v32_v6, 4  ;;  %v42_v9 = vrot.slane %v41_v7, 4  ;;  %p142_p9 = scmp.lt.s32.totalorder %s82_s26, %s82_s26  ;;  %p143_p10 = scmp.lt.s32.totalorder %s141_s30, %s137_s29 }
  0x1a   :  { %v34_v10 = vmin.f32 %v32_v6, %v33_v8  ;;  %v43_v11 = vmax.f32 %v41_v7, %v42_v9  ;;  %p144_p11 = por %p143_p10, %p142_p9 }
  0x1c   :  { %v35_v12 = vrot.slane %v34_v10, 2  ;;  %v44_v13 = vrot.slane %v43_v11, 2  ;;  %p145_p12 = pnand %p144_p11, %p138_p8 }
  0x1e   :  { %v36_v14 = vmin.f32 %v34_v10, %v35_v12  ;;  %v45_v15 = vmax.f32 %v43_v11, %v44_v13 }
  0x20   :  { %v37_v16 = vrot.slane %v36_v14, 1  ;;  %v46_v17 = vrot.slane %v45_v15, 1 }
  0x22   :  { %v38_v18 = vmin.f32 %v36_v14, %v37_v16  ;;  %v47_v19 = vmax.f32 %v45_v15, %v46_v17 }
  0x24   :  { %49 = vst.msk [vmem:[#allocation6] sm:$0x1] %vm48_vm1, %v38_v18  ;;  %50 = vst.msk [vmem:[#allocation8] sm:$0x1] %vm48_vm1, %v47_v19  ;;  %v51_v20 = vsub.f32 %v47_v19, %v38_v18 }
  0x25   :  { %148 = shalt.err (!%p145_p12)
}
  0x26   :  { %s149_s6 = scalar_lea.hbm %s315_s2, 16 }
  0x27   :  { %p150_p13 = scmp.ne.s32.totalorder %s315_s2, %s149_s6  ;;  %p153_p0 = scmp.lt.u32.totalorder %s149_s6, %s315_s2 }
  0x29   :  { %p155_p1 = pnand %p153_p0, %p150_p13 }
  0x2b   :  { %158 = shalt.err (!%p155_p1)
}
  0x2c   :  { %84 = dma.vmem_to_hbm [thread:$0]  %s82_s26, 16, %s315_s2, [#allocation7]   ;;  %v52_v21 = vadd.f32 1e-08, %v51_v20 }
  0x2d   :  { %s159_s13 = scalar_lea.vmem %s262_s28, 16  ;;  %s163_s14 = scalar_lea.vmem %s262_s28, 32 }
  0x2e   :  { %p160_p2 = scmp.ne.s32.totalorder %s262_s28, %s159_s13  ;;  %p164_p3 = scmp.lt.s32.totalorder %s262_s28, %s262_s28 }
  0x2f   :  { %p165_p4 = scmp.lt.s32.totalorder %s163_s14, %s159_s13 }
  0x31   :  { %p166_p5 = por %p165_p4, %p164_p3 }
  0x33   :  { %p167_p6 = pnand %p166_p5, %p160_p2 }
  0x35   :  { %170 = shalt.err (!%p167_p6)
}
  0x36   :  { %s171_s17 = scalar_lea.hbm %s316_s3, 16 }
  0x37   :  { %p172_p7 = scmp.ne.s32.totalorder %s316_s3, %s171_s17  ;;  %p175_p8 = scmp.lt.u32.totalorder %s171_s17, %s316_s3 }
  0x39   :  { %p177_p9 = pnand %p175_p8, %p172_p7 }
  0x3b   :  { %180 = shalt.err (!%p177_p9)
}
  0x3c   :  { %94 = dma.vmem_to_hbm [thread:$0]  %s262_s28, 16, %s316_s3, [#allocation7]   ;;  %113 = vrcp.f32 %v52_v21 }
  0x3d   :  { %s214_s25 = smov [#allocation5]  }
  0x3e   :  { %s68_s0 = sshll.u32 %s214_s25, 4  ;;  %s69_s0 = int_to_ptr.vmem [resolvable:$true] %s68_s0 }
  0x3f   :  { %s181_s26 = scalar_lea.vmem %s69_s0, 256  ;;  %p186_p11 = scmp.lt.s32.totalorder %s69_s0, %s69_s0 }
  0x40   :  { %p182_p10 = scmp.ne.s32.totalorder %s69_s0, %s181_s26  ;;  %p187_p12 = scmp.lt.s32.totalorder %s181_s26, %s181_s26 }
  0x42   :  { %p188_p13 = por %p187_p12, %p186_p11 }
  0x44   :  { %p189_p0 = pnand %p188_p13, %p182_p10 }
  0x46   :  { %v114_v22 = vpop.eup %113 }
  0x47   :  { %v54_v23 = vmul.f32 2.0, %v114_v22 }
  0x49   :  { %v55_v24 = vmul.f32 %v54_v23, %v38_v18  ;;  %v57_v25 = vmul.f32 %v54_v23, %v250_v0  ;;  %v58_v26 = vmul.f32 %v54_v23, %v252_v1 }
  0x4b   :  { %v56_v27 = vsub.f32 -1.0, %v55_v24 }
  0x4d   :  { %v59_v28 = vadd.f32 %v57_v25, %v56_v27  ;;  %v60_v29 = vadd.f32 %v58_v26, %v56_v27 }
  0x4f   :  { %61 = vst.msk [vmem:[#allocation5] sm:$0xff] %vm29_vm0, %v59_v28  ;;  %62 = vst.msk [vmem:[#allocation5 + $0x8] sm:$0xff] %vm29_vm0, %v60_v29 }
  0x50   :  { %192 = shalt.err (!%p189_p0)
}
  0x51   :  { %s193_s28 = scalar_lea.hbm %s314_s1, 256 }
  0x52   :  { %p194_p1 = scmp.ne.s32.totalorder %s314_s1, %s193_s28  ;;  %p197_p2 = scmp.lt.u32.totalorder %s193_s28, %s314_s1 }
  0x54   :  { %p199_p3 = pnand %p197_p2, %p194_p1 }
  0x56   :  { %202 = shalt.err (!%p199_p3)
}
  0x57   :  { %74 = dma.vmem_to_hbm [thread:$0]  %s69_s0, 256, %s314_s1, [#allocation4], %s210_s22, %s210_s22, %s211_s23  }
  0x58   :  { %205 = dma.done.wait [#allocation4], 256  }
  0x59   :  { %206 = vsyncadd [#allocation4], 4294967040 }
  0x5a   :  { %207 = dma.done.wait [#allocation7], 32  }
  0x5b   :  { %208 = vsyncadd [#allocation7], 4294967264 }
  0x5c   :  { %104 = vsyncpa [#allocation3], 1 }
  0x5d   :  { %105 = vsyncpa [#allocation4], 1 }
  0x5e   :  { %106 = vsyncpa [#allocation7], 1 }

</bundles_post_ra>
